<compile_context>
chip_gen: v7x
topology: tpu7x:2x2x1
jax: 0.10.0
libtpu: 0.0.40
codegen_flags: <defaults>
</compile_context>

<pallas_src>
import jax
import jax.numpy as jnp
from jax.experimental import pallas as pl
from jax.experimental.pallas import tpu as pltpu

IMAGE_DIM = 28 * 28      # 784
HIDDEN_DIM = 256
MAX_TILE_B = 2048        # batch-tile upper bound (VMEM-safe on v5e/v6e/v7x)


def _round_up(n, m):
    return (n + m - 1) // m * m


def _leaky_relu(x, slope=0.2):
    return jnp.where(x > 0, x, slope * x)


def discriminator_kernel(x_ref, w1_ref, b1_ref, w2_ref, b2_ref, w3_ref, b3_ref,
                         o_ref):
    # x block: (TILE_B, 784) f32.  Cast to bf16 in-kernel (VPU) so the wrapper
    # never makes a separate HBM pass over the activations.
    x = x_ref[...].astype(jnp.bfloat16)

    # Layer 1: bf16 MXU matmul at K=784, f32 accumulation; elementwise in f32.
    h1 = jnp.dot(x, w1_ref[...], preferred_element_type=jnp.float32)
    h1 = _leaky_relu(h1 + b1_ref[...])

    # Layer 2: re-cast activation to bf16 for the MXU, accumulate in f32.
    h2 = jnp.dot(h1.astype(jnp.bfloat16), w2_ref[...],
                 preferred_element_type=jnp.float32)
    h2 = _leaky_relu(h2 + b2_ref[...])

    # Layer 3 (256 -> 1): VPU multiply + cross-lane sum (XLU) instead of an
    # N=1 matmul that would waste the MXU output width.
    h3 = jnp.sum(h2 * w3_ref[...], axis=-1, keepdims=True) + b3_ref[...]

    # Sigmoid with an exact divide (no approx-reciprocal overshoot above 1.0).
    o_ref[...] = 1.0 / (1.0 + jnp.exp(-h3))


def _choose_tile_b(batch):
    """Batch tile: large enough to amortize per-step overhead, split into
    >= 2 grid steps when possible so v7x's two TensorCores both get work."""
    b16 = _round_up(batch, 16)
    if b16 <= 16:
        return 16
    return min(MAX_TILE_B, _round_up(pl.cdiv(b16, 2), 16))


def discriminator_forward(img, params):
    """img: (B, 1, 28, 28) float32 NCHW. Returns (B, 1) validity scores."""
    w1, b1, w2, b2, w3, b3 = params
    batch = img.shape[0]
    x = img.reshape(batch, IMAGE_DIM)  # same semantics as torch view(-1, 784)

    tile_b = _choose_tile_b(batch)
    b_pad = _round_up(batch, tile_b)
    if b_pad != batch:
        # Only pad the batch when the tile does not divide it: keeps garbage
        # rows out of the compute without a copy on common batch sizes.
        x = jnp.pad(x, ((0, b_pad - batch), (0, 0)))

    # One-time layout prep (weights only; tiny vs. activation traffic).
    w1_p = w1.astype(jnp.bfloat16)                        # (784, 256)
    w2_p = w2.astype(jnp.bfloat16)                        # (256, 256)
    w3_p = w3.reshape(1, HIDDEN_DIM).astype(jnp.float32)  # row for VPU reduce

    grid = (b_pad // tile_b,)

    flops = 2 * b_pad * (IMAGE_DIM * HIDDEN_DIM + HIDDEN_DIM * HIDDEN_DIM
                         + HIDDEN_DIM)
    bytes_accessed = (b_pad * IMAGE_DIM * 4                           # x (f32)
                      + (IMAGE_DIM + HIDDEN_DIM) * HIDDEN_DIM * 2     # w1, w2
                      + (3 * HIDDEN_DIM + 1) * 4                      # b1,b2,w3,b3
                      + b_pad * 4)                                    # output

    out = pl.pallas_call(
        discriminator_kernel,
        out_shape=jax.ShapeDtypeStruct((b_pad, 1), jnp.float32),
        grid=grid,
        in_specs=[
            pl.BlockSpec((tile_b, IMAGE_DIM), lambda i: (i, 0)),         # x
            pl.BlockSpec((IMAGE_DIM, HIDDEN_DIM), lambda i: (0, 0)),     # w1
            pl.BlockSpec((1, HIDDEN_DIM), lambda i: (0, 0)),             # b1
            pl.BlockSpec((HIDDEN_DIM, HIDDEN_DIM), lambda i: (0, 0)),    # w2
            pl.BlockSpec((1, HIDDEN_DIM), lambda i: (0, 0)),             # b2
            pl.BlockSpec((1, HIDDEN_DIM), lambda i: (0, 0)),             # w3
            pl.BlockSpec((1, 1), lambda i: (0, 0)),                      # b3
        ],
        out_specs=pl.BlockSpec((tile_b, 1), lambda i: (i, 0)),
        compiler_params=pltpu.CompilerParams(
            dimension_semantics=("parallel",),
            # Headroom for tile_b=2048 f32 x blocks (double-buffered ~13 MB)
            # while staying under v7x's 64 MiB physical VMEM.
            vmem_limit_bytes=48 * 1024 * 1024,
        ),
        cost_estimate=pl.CostEstimate(
            flops=flops,
            transcendentals=b_pad,
            bytes_accessed=bytes_accessed,
        ),
    )(x, w1_p, b1, w2_p, b2, w3_p, b3)

    return out[:batch]


def init_params(key):
    """Deterministic parameter init (Kaiming-uniform-ish, like nn.Linear)."""
    k1, k2, k3, k4, k5, k6 = jax.random.split(key, 6)

    def uniform(k, shape, fan_in):
        bound = 1.0 / jnp.sqrt(fan_in)
        return jax.random.uniform(k, shape, jnp.float32, -bound, bound)

    w1 = uniform(k1, (IMAGE_DIM, HIDDEN_DIM), IMAGE_DIM)
    b1 = uniform(k2, (1, HIDDEN_DIM), IMAGE_DIM)
    w2 = uniform(k3, (HIDDEN_DIM, HIDDEN_DIM), HIDDEN_DIM)
    b2 = uniform(k4, (1, HIDDEN_DIM), HIDDEN_DIM)
    w3 = uniform(k5, (HIDDEN_DIM, 1), HIDDEN_DIM)
    b3 = uniform(k6, (1, 1), HIDDEN_DIM)
    return (w1, b1, w2, b2, w3, b3)


def reference_forward(img, params):
    """Plain-JAX reference mirroring the kernel's bf16-matmul / f32-acc math."""
    w1, b1, w2, b2, w3, b3 = params
    x = img.reshape(img.shape[0], IMAGE_DIM)
    h1 = _leaky_relu(
        jnp.dot(x.astype(jnp.bfloat16), w1.astype(jnp.bfloat16),
                preferred_element_type=jnp.float32) + b1)
    h2 = _leaky_relu(
        jnp.dot(h1.astype(jnp.bfloat16), w2.astype(jnp.bfloat16),
                preferred_element_type=jnp.float32) + b2)
    h3 = jnp.sum(h2 * w3.reshape(1, HIDDEN_DIM), axis=-1, keepdims=True) + b3
    return jax.nn.sigmoid(h3)


if __name__ == "__main__":
    key = jax.random.PRNGKey(0)
    pkey, xkey = jax.random.split(key)

    params = init_params(pkey)
    # Small batch of MNIST-shaped inputs (NCHW), values in [-1, 1] like GAN data.
    img = jax.random.uniform(xkey, (2, 1, 28, 28), jnp.float32, -1.0, 1.0)

    out = discriminator_forward(img, params)
    out = jax.block_until_ready(out)

    ref = reference_forward(img, params)
    assert out.shape == (2, 1), out.shape
    # Tolerance covers bf16 matmul inputs (kernel and reference match in this).
    assert jnp.allclose(out, ref, atol=5e-3, rtol=5e-3), (out, ref)
    assert bool(jnp.all((out >= 0.0) & (out <= 1.0)))

    print("KERNEL_OK")
</pallas_src>

<mosaic_0001>
module attributes {stable_mosaic.version = 11 : i64} {
  func.func @discriminator_kernel(%arg0: i32, %arg1: memref<16x784xf32, #tpu.memory_space<vmem>>, %arg2: memref<784x256xbf16, #tpu.memory_space<vmem>>, %arg3: memref<1x256xf32, #tpu.memory_space<vmem>>, %arg4: memref<256x256xbf16, #tpu.memory_space<vmem>>, %arg5: memref<1x256xf32, #tpu.memory_space<vmem>>, %arg6: memref<1x256xf32, #tpu.memory_space<vmem>>, %arg7: memref<1x1xf32, #tpu.memory_space<vmem>>, %arg8: memref<16x1xf32, #tpu.memory_space<vmem>>) attributes {dimension_semantics = [#tpu.dimension_semantics<parallel>], iteration_bounds = array<i64: 1>, scalar_prefetch = 0 : i64, scratch_operands = 0 : i64, tpu.core_type = #tpu.core_type<tc>, window_params = [{transform_indices = @transform_0, window_bounds = array<i64: 16, 784>}, {pipeline_mode = #tpu.pipeline_mode<synchronous>, transform_indices = @transform_1, window_bounds = array<i64: 784, 256>}, {pipeline_mode = #tpu.pipeline_mode<synchronous>, transform_indices = @transform_2, window_bounds = array<i64: 1, 256>}, {pipeline_mode = #tpu.pipeline_mode<synchronous>, transform_indices = @transform_3, window_bounds = array<i64: 256, 256>}, {pipeline_mode = #tpu.pipeline_mode<synchronous>, transform_indices = @transform_4, window_bounds = array<i64: 1, 256>}, {pipeline_mode = #tpu.pipeline_mode<synchronous>, transform_indices = @transform_5, window_bounds = array<i64: 1, 256>}, {pipeline_mode = #tpu.pipeline_mode<synchronous>, transform_indices = @transform_6, window_bounds = array<i64: 1, 1>}, {transform_indices = @transform_7, window_bounds = array<i64: 16, 1>}]} {
    %c0 = arith.constant 0 : index
    %c0_0 = arith.constant 0 : index
    %0 = vector.load %arg1[%c0, %c0_0] : memref<16x784xf32, #tpu.memory_space<vmem>>, vector<16x784xf32>
    %1 = arith.truncf %0 : vector<16x784xf32> to vector<16x784xbf16>
    %c0_1 = arith.constant 0 : index
    %c0_2 = arith.constant 0 : index
    %2 = vector.load %arg2[%c0_1, %c0_2] : memref<784x256xbf16, #tpu.memory_space<vmem>>, vector<784x256xbf16>
    %cst = arith.constant dense<0.000000e+00> : vector<16x256xf32>
    %3 = tpu.matmul %1, %2, %cst {dimension_numbers = #tpu.dot_dimension_numbers<[1], [0], [0], [1], [0, 0, 1, 1], [], []>} : vector<16x784xbf16>, vector<784x256xbf16>, vector<16x256xf32> -> vector<16x256xf32>
    %c0_3 = arith.constant 0 : index
    %c0_4 = arith.constant 0 : index
    %4 = vector.load %arg3[%c0_3, %c0_4] : memref<1x256xf32, #tpu.memory_space<vmem>>, vector<1x256xf32>
    %5 = vector.broadcast %4 : vector<1x256xf32> to vector<16x256xf32>
    %6 = arith.addf %3, %5 : vector<16x256xf32>
    %cst_5 = arith.constant 0.000000e+00 : f32
    %7 = vector.broadcast %cst_5 : f32 to vector<16x256xf32>
    %8 = arith.cmpf ogt, %6, %7 : vector<16x256xf32>
    %cst_6 = arith.constant 2.000000e-01 : f32
    %9 = vector.broadcast %cst_6 : f32 to vector<16x256xf32>
    %10 = arith.mulf %9, %6 : vector<16x256xf32>
    %11 = arith.select %8, %6, %10 : vector<16x256xi1>, vector<16x256xf32>
    %12 = arith.truncf %11 : vector<16x256xf32> to vector<16x256xbf16>
    %c0_7 = arith.constant 0 : index
    %c0_8 = arith.constant 0 : index
    %13 = vector.load %arg4[%c0_7, %c0_8] : memref<256x256xbf16, #tpu.memory_space<vmem>>, vector<256x256xbf16>
    %cst_9 = arith.constant dense<0.000000e+00> : vector<16x256xf32>
    %14 = tpu.matmul %12, %13, %cst_9 {dimension_numbers = #tpu.dot_dimension_numbers<[1], [0], [0], [1], [0, 0, 1, 1], [], []>} : vector<16x256xbf16>, vector<256x256xbf16>, vector<16x256xf32> -> vector<16x256xf32>
    %c0_10 = arith.constant 0 : index
    %c0_11 = arith.constant 0 : index
    %15 = vector.load %arg5[%c0_10, %c0_11] : memref<1x256xf32, #tpu.memory_space<vmem>>, vector<1x256xf32>
    %16 = vector.broadcast %15 : vector<1x256xf32> to vector<16x256xf32>
    %17 = arith.addf %14, %16 : vector<16x256xf32>
    %cst_12 = arith.constant 0.000000e+00 : f32
    %18 = vector.broadcast %cst_12 : f32 to vector<16x256xf32>
    %19 = arith.cmpf ogt, %17, %18 : vector<16x256xf32>
    %cst_13 = arith.constant 2.000000e-01 : f32
    %20 = vector.broadcast %cst_13 : f32 to vector<16x256xf32>
    %21 = arith.mulf %20, %17 : vector<16x256xf32>
    %22 = arith.select %19, %17, %21 : vector<16x256xi1>, vector<16x256xf32>
    %c0_14 = arith.constant 0 : index
    %c0_15 = arith.constant 0 : index
    %23 = vector.load %arg6[%c0_14, %c0_15] : memref<1x256xf32, #tpu.memory_space<vmem>>, vector<1x256xf32>
    %24 = vector.broadcast %23 : vector<1x256xf32> to vector<16x256xf32>
    %25 = arith.mulf %22, %24 : vector<16x256xf32>
    %cst_16 = arith.constant dense<0.000000e+00> : vector<16xf32>
    %26 = vector.multi_reduction <add>, %25, %cst_16 [1] : vector<16x256xf32> to vector<16xf32>
    %27 = vector.shape_cast %26 : vector<16xf32> to vector<16x1xf32>
    %c0_17 = arith.constant 0 : index
    %c0_18 = arith.constant 0 : index
    %28 = vector.load %arg7[%c0_17, %c0_18] : memref<1x1xf32, #tpu.memory_space<vmem>>, vector<1x1xf32>
    %29 = vector.broadcast %28 : vector<1x1xf32> to vector<16x1xf32>
    %30 = arith.addf %27, %29 : vector<16x1xf32>
    %cst_19 = arith.constant 0.000000e+00 : f32
    %31 = vector.broadcast %cst_19 : f32 to vector<16x1xf32>
    %32 = arith.subf %31, %30 : vector<16x1xf32>
    %33 = math.exp %32 : vector<16x1xf32>
    %cst_20 = arith.constant 1.000000e+00 : f32
    %34 = vector.broadcast %cst_20 : f32 to vector<16x1xf32>
    %35 = arith.addf %34, %33 : vector<16x1xf32>
    %cst_21 = arith.constant 1.000000e+00 : f32
    %36 = vector.broadcast %cst_21 : f32 to vector<16x1xf32>
    %37 = arith.divf %36, %35 : vector<16x1xf32>
    %c0_22 = arith.constant 0 : index
    %c0_23 = arith.constant 0 : index
    %38 = vector.load %arg8[%c0_22, %c0_23] : memref<16x1xf32, #tpu.memory_space<vmem>>, vector<16x1xf32>
    tpu.vector_store %arg8[%c0_22, %c0_23], %37 {strides = array<i32>} : memref<16x1xf32, #tpu.memory_space<vmem>>, vector<16x1xf32>,
    return
  }
  func.func @transform_0(%arg0: i32) -> (i32, i32) {
    %c0_i32 = arith.constant 0 : i32
    %c0_i32_0 = arith.constant 0 : i32
    return %arg0, %c0_i32 : i32, i32
  }
  func.func @transform_1(%arg0: i32) -> (i32, i32) {
    %c0_i32 = arith.constant 0 : i32
    %c0_i32_0 = arith.constant 0 : i32
    %c0_i32_1 = arith.constant 0 : i32
    return %c0_i32, %c0_i32_0 : i32, i32
  }
  func.func @transform_2(%arg0: i32) -> (i32, i32) {
    %c0_i32 = arith.constant 0 : i32
    %c0_i32_0 = arith.constant 0 : i32
    %c0_i32_1 = arith.constant 0 : i32
    return %c0_i32, %c0_i32_0 : i32, i32
  }
  func.func @transform_3(%arg0: i32) -> (i32, i32) {
    %c0_i32 = arith.constant 0 : i32
    %c0_i32_0 = arith.constant 0 : i32
    %c0_i32_1 = arith.constant 0 : i32
    return %c0_i32, %c0_i32_0 : i32, i32
  }
  func.func @transform_4(%arg0: i32) -> (i32, i32) {
    %c0_i32 = arith.constant 0 : i32
    %c0_i32_0 = arith.constant 0 : i32
    %c0_i32_1 = arith.constant 0 : i32
    return %c0_i32, %c0_i32_0 : i32, i32
  }
  func.func @transform_5(%arg0: i32) -> (i32, i32) {
    %c0_i32 = arith.constant 0 : i32
    %c0_i32_0 = arith.constant 0 : i32
    %c0_i32_1 = arith.constant 0 : i32
    return %c0_i32, %c0_i32_0 : i32, i32
  }
  func.func @transform_6(%arg0: i32) -> (i32, i32) {
    %c0_i32 = arith.constant 0 : i32
    %c0_i32_0 = arith.constant 0 : i32
    %c0_i32_1 = arith.constant 0 : i32
    return %c0_i32, %c0_i32_0 : i32, i32
  }
  func.func @transform_7(%arg0: i32) -> (i32, i32) {
    %c0_i32 = arith.constant 0 : i32
    %c0_i32_0 = arith.constant 0 : i32
    return %arg0, %c0_i32 : i32, i32
  }
}

</mosaic_0001>

<bundles_post_ra>
// kernel: tpu_custom_call.1
= control target key start
LH: loop header
LB: loop body
LE: loop exit
PB: predicated region body
PF: predicated region fallthrough
CT: control target
= control target key end

     0   :  { %s1729_s0 = inlined_call_operand.hbm [shape: f32[16,784], index: 0, kind: input, shape index: {}]   ;;  %s1730_s1 = inlined_call_operand.hbm [shape: bf16[784,256], index: 1, kind: input, shape index: {}]   ;;  %s1731_s2 = inlined_call_operand.vmem [shape: f32[1,256], index: 2, kind: input, shape index: {}]   ;;  %s1732_s3 = inlined_call_operand.hbm [shape: bf16[256,256], index: 3, kind: input, shape index: {}]   ;;  %s1733_s4 = inlined_call_operand.vmem [shape: f32[1,256], index: 4, kind: input, shape index: {}]   ;;  %s1734_s5 = inlined_call_operand.vmem [shape: f32[1,256], index: 5, kind: input, shape index: {}]   ;;  %s1735_s6 = inlined_call_operand.<no memory space> [shape: f32[1,1], index: 6, kind: input, shape index: {}]   ;;  %s1736_s7 = inlined_call_operand.vmem [shape: f32[16,1], index: 7, kind: output, shape index: {}]  }
   0x1   :  { %v12_v0 = vstv %s1735_s6 }
   0x2   :  { %13 = vst [vmem:[#allocation2] sm:$0x1] %v12_v0 }
   0x3   :  { %14 = vsyncpa [#allocation4], 0 }
   0x4   :  { %15 = vsyncpa [#allocation6], 0  ;;  %s1621_s26 = smov [#allocation5]   ;;  %s1551_s30 = scalar_lea.hbm %s1730_s1, 12544 }
   0x5   :  { %s33_s27 = sshll.u32 %s1621_s26, 4  ;;  %p1552_p0 = scmp.ne.s32.totalorder %s1730_s1, %s1551_s30  ;;  %s34_s27 = int_to_ptr.vmem [resolvable:$true] %s33_s27 }
   0x6   :  { %p1555_p1 = scmp.lt.u32.totalorder %s1551_s30, %s1730_s1 }
   0x8   :  { %p1557_p2 = pnand %p1555_p1, %p1552_p0 }
   0xa   :  { %1560 = shalt.err (!%p1557_p2)
}
   0xb   :  { %s1561_s6 = scalar_lea.vmem %s34_s27, 12544  ;;  %p1566_p4 = scmp.lt.s32.totalorder %s34_s27, %s34_s27 }
   0xc   :  { %p1562_p3 = scmp.ne.s32.totalorder %s34_s27, %s1561_s6  ;;  %p1567_p5 = scmp.lt.s32.totalorder %s1561_s6, %s1561_s6 }
   0xe   :  { %p1568_p6 = por %p1567_p5, %p1566_p4 }
  0x10   :  { %p1569_p7 = pnand %p1568_p6, %p1562_p3 }
  0x12   :  { %1572 = shalt.err (!%p1569_p7)
}
  0x13   :  { %s1622_s12 = smov 128   ;;  %s1623_s13 = smov 8  }
  0x14   :  { %39 = dma.hbm_to_vmem [thread:$0]  %s1730_s1, 12544, %s34_s27, [#allocation6], %s1622_s12, %s1622_s12, %s1623_s13  }
  0x15   :  { %s1624_s16 = smov [#allocation3]   ;;  %s1573_s20 = scalar_lea.hbm %s1729_s0, 1792 }
  0x16   :  { %s21_s17 = sshll.u32 %s1624_s16, 4  ;;  %p1574_p8 = scmp.ne.s32.totalorder %s1729_s0, %s1573_s20  ;;  %s22_s17 = int_to_ptr.vmem [resolvable:$true] %s21_s17 }
  0x17   :  { %p1577_p9 = scmp.lt.u32.totalorder %s1573_s20, %s1729_s0 }
  0x19   :  { %p1579_p10 = pnand %p1577_p9, %p1574_p8 }
  0x1b   :  { %1582 = shalt.err (!%p1579_p10)
}
  0x1c   :  { %s1583_s25 = scalar_lea.vmem %s22_s17, 1792  ;;  %p1588_p12 = scmp.lt.s32.totalorder %s22_s17, %s22_s17 }
  0x1d   :  { %p1584_p11 = scmp.ne.s32.totalorder %s22_s17, %s1583_s25  ;;  %p1589_p13 = scmp.lt.s32.totalorder %s1583_s25, %s1583_s25 }
  0x1f   :  { %p1590_p0 = por %p1589_p13, %p1588_p12 }
  0x21   :  { %p1591_p1 = pnand %p1590_p0, %p1584_p11 }
  0x23   :  { %1594 = shalt.err (!%p1591_p1)
}
  0x24   :  { %s1625_s1 = smov 896   ;;  %s1626_s26 = smov 56  }
  0x25   :  { %27 = dma.hbm_to_vmem [thread:$0]  %s1729_s0, 1792, %s22_s17, [#allocation4], %s1625_s1, %s1625_s1, %s1626_s26  }
  0x26   :  { %s1627_s29 = smov [#allocation7]   ;;  %s1595_s10 = scalar_lea.hbm %s1732_s3, 4096 }
  0x27   :  { %s47_s30 = sshll.u32 %s1627_s29, 4  ;;  %p1596_p2 = scmp.ne.s32.totalorder %s1732_s3, %s1595_s10  ;;  %s48_s30 = int_to_ptr.vmem [resolvable:$true] %s47_s30 }
  0x28   :  { %p1599_p3 = scmp.lt.u32.totalorder %s1595_s10, %s1732_s3 }
  0x2a   :  { %p1601_p4 = pnand %p1599_p3, %p1596_p2 }
  0x2c   :  { %1604 = shalt.err (!%p1601_p4)
}
  0x2d   :  { %s1605_s16 = scalar_lea.vmem %s48_s30, 4096  ;;  %p1610_p6 = scmp.lt.s32.totalorder %s48_s30, %s48_s30 }
  0x2e   :  { %p1606_p5 = scmp.ne.s32.totalorder %s48_s30, %s1605_s16  ;;  %p1611_p7 = scmp.lt.s32.totalorder %s1605_s16, %s1605_s16 }
  0x30   :  { %p1612_p8 = por %p1611_p7, %p1610_p6 }
  0x32   :  { %p1613_p9 = pnand %p1612_p8, %p1606_p5 }
  0x34   :  { %1616 = shalt.err (!%p1613_p9)
}
  0x35   :  { %53 = dma.hbm_to_vmem [thread:$0]  %s1732_s3, 4096, %s48_s30, [#allocation6], %s1622_s12, %s1622_s12, %s1623_s13  }
  0x36   :  { %1617 = dma.done.wait [#allocation4], 1792  }
  0x37   :  { %1618 = vsyncadd [#allocation4], 4294965504 }
  0x38   :  { %1619 = dma.done.wait [#allocation6], 16640  }
  0x39   :  { %1620 = vsyncadd [#allocation6], 4294950656  ;;  %v1348_v1 = vld [vmem:[#allocation5 + $0x104] ss:$8 sps:$4 sm:$0xff]   ;;  %v1350_v2 = vld [vmem:[#allocation5 + $0x100] ss:$8 sps:$4 sm:$0xff]  }
  0x3a   :  { %738 = vmatprep.subr.bf16.mxu0 %v1348_v1  ;;  %v1351_v3 = vld [vmem:[#allocation5 + $0x114] ss:$8 sps:$4 sm:$0xff]   ;;  %v1353_v4 = vld [vmem:[#allocation5 + $0x110] ss:$8 sps:$4 sm:$0xff]   ;;  %v1354_v5 = vld [vmem:[#allocation5 + $0x124] ss:$8 sps:$4 sm:$0xff]  }
  0x3b   :  { %739 = vmatpush1.bf16.msra.mxu0 %v1350_v2  ;;  %v1356_v6 = vld [vmem:[#allocation5 + $0x120] ss:$8 sps:$4 sm:$0xff]   ;;  %v1357_v7 = vld [vmem:[#allocation5 + $0x134] ss:$8 sps:$4 sm:$0xff]   ;;  %v1359_v8 = vld [vmem:[#allocation5 + $0x130] ss:$8 sps:$4 sm:$0xff]  }
  0x3c   :  { %740 = vmatprep.subr.bf16.mxu0 %v1351_v3  ;;  %v1360_v9 = vld [vmem:[#allocation5 + $0x144] ss:$8 sps:$4 sm:$0xff]   ;;  %v1362_v10 = vld [vmem:[#allocation5 + $0x140] ss:$8 sps:$4 sm:$0xff]   ;;  %v1363_v11 = vld [vmem:[#allocation5 + $0x154] ss:$8 sps:$4 sm:$0xff]  }
  0x3d   :  { %v1365_v12 = vld [vmem:[#allocation5 + $0x150] ss:$8 sps:$4 sm:$0xff]   ;;  %v1366_v13 = vld [vmem:[#allocation5 + $0x164] ss:$8 sps:$4 sm:$0xff]   ;;  %v1368_v17 = vld [vmem:[#allocation5 + $0x160] ss:$8 sps:$4 sm:$0xff]  }
  0x3e   :  { %v73_v14 = vld [vmem:[#allocation3 + $0x18] sm:$0xff]  ;;  %v80_v15 = vld [vmem:[#allocation3 + $0x50] sm:$0xff]  ;;  %v1369_v18 = vld [vmem:[#allocation5 + $0x174] ss:$8 sps:$4 sm:$0xff]   ;;  %vm691_vm0 = vcmask 130048   ;;  %vm1183_vm9 = vcmask 7168  }
  0x3f   :  { %741 = vmatpush1.bf16.msra.mxu0 %v1353_v4  ;;  %v87_v16 = vpack.c.bf16 %v80_v15, %v73_v14  ;;  %v1402_v19 = vld [vmem:[#allocation5 + $0x4] ss:$8 sps:$4 sm:$0xff]   ;;  %v1371_v20 = vld [vmem:[#allocation5 + $0x170] ss:$8 sps:$4 sm:$0xff]   ;;  %v1407_v22 = vld [vmem:[#allocation5] ss:$8 sps:$4 sm:$0xff]  }
  0x40   :  { %742 = vmatprep.subr.bf16.mxu0 %v1354_v5  ;;  %v1372_v21 = vld [vmem:[#allocation5 + $0x184] ss:$8 sps:$4 sm:$0xff]   ;;  %695 = vmatprep.subr.bf16.mxu1 %v1402_v19  ;;  %v1408_v23 = vld [vmem:[#allocation5 + $0x14] ss:$8 sps:$4 sm:$0xff]   ;;  %v1374_v24 = vld [vmem:[#allocation5 + $0x180] ss:$8 sps:$4 sm:$0xff]  }
  0x41   :  { %770 = vmatprep.mubr.bf16.mxu0 %v87_v16  ;;  %696 = vmatpush1.bf16.msra.mxu1 %v1407_v22  ;;  %v1413_v25 = vld [vmem:[#allocation5 + $0x10] ss:$8 sps:$4 sm:$0xff]   ;;  %v1414_v26 = vld [vmem:[#allocation5 + $0x24] ss:$8 sps:$4 sm:$0xff]   ;;  %v1375_v27 = vld [vmem:[#allocation5 + $0x194] ss:$8 sps:$4 sm:$0xff]  }
  0x42   :  { %697 = vmatprep.subr.bf16.mxu1 %v1408_v23  ;;  %v1419_v28 = vld [vmem:[#allocation5 + $0x20] ss:$8 sps:$4 sm:$0xff]   ;;  %v1420_v29 = vld [vmem:[#allocation5 + $0x34] ss:$8 sps:$4 sm:$0xff]   ;;  %v1377_v30 = vld [vmem:[#allocation5 + $0x190] ss:$8 sps:$4 sm:$0xff]  }
  0x43   :  { %743 = vmatpush1.bf16.msra.mxu0 %v1356_v6  ;;  %v1378_v31 = vld [vmem:[#allocation5 + $0x1a4] ss:$8 sps:$4 sm:$0xff]   ;;  %v1425_v32 = vld [vmem:[#allocation5 + $0x30] ss:$8 sps:$4 sm:$0xff]   ;;  %v1380_v34 = vld [vmem:[#allocation5 + $0x1a0] ss:$8 sps:$4 sm:$0xff]  }
  0x44   :  { %744 = vmatprep.subr.bf16.mxu0 %v1357_v7  ;;  %v1426_v33 = vld [vmem:[#allocation5 + $0x44] ss:$8 sps:$4 sm:$0xff]   ;;  %v1381_v35 = vld [vmem:[#allocation5 + $0x1b4] ss:$8 sps:$4 sm:$0xff]   ;;  %v1431_v36 = vld [vmem:[#allocation5 + $0x40] ss:$8 sps:$4 sm:$0xff]  }
  0x45   :  { %698 = vmatpush1.bf16.msra.mxu1 %v1413_v25  ;;  %v1432_v37 = vld [vmem:[#allocation5 + $0x54] ss:$8 sps:$4 sm:$0xff]   ;;  %v1383_v38 = vld [vmem:[#allocation5 + $0x1b0] ss:$8 sps:$4 sm:$0xff]   ;;  %v1384_v39 = vld [vmem:[#allocation5 + $0x1c4] ss:$8 sps:$4 sm:$0xff]  }
  0x46   :  { %699 = vmatprep.subr.bf16.mxu1 %v1414_v26  ;;  %v1437_v40 = vld [vmem:[#allocation5 + $0x50] ss:$8 sps:$4 sm:$0xff]   ;;  %v1438_v41 = vld [vmem:[#allocation5 + $0x64] ss:$8 sps:$4 sm:$0xff]   ;;  %v1386_v42 = vld [vmem:[#allocation5 + $0x1c0] ss:$8 sps:$4 sm:$0xff]  }
  0x47   :  { %745 = vmatpush1.bf16.msra.mxu0 %v1359_v8  ;;  %v1387_v43 = vld [vmem:[#allocation5 + $0x1d4] ss:$8 sps:$4 sm:$0xff]   ;;  %v1443_v44 = vld [vmem:[#allocation5 + $0x60] ss:$8 sps:$4 sm:$0xff]   ;;  %v1389_v46 = vld [vmem:[#allocation5 + $0x1d0] ss:$8 sps:$4 sm:$0xff]  }
  0x48   :  { %746 = vmatprep.subr.bf16.mxu0 %v1360_v9  ;;  %v1444_v45 = vld [vmem:[#allocation5 + $0x74] ss:$8 sps:$4 sm:$0xff]   ;;  %v1390_v47 = vld [vmem:[#allocation5 + $0x1e4] ss:$8 sps:$4 sm:$0xff]   ;;  %v1449_v48 = vld [vmem:[#allocation5 + $0x70] ss:$8 sps:$4 sm:$0xff]  }
  0x49   :  { %700 = vmatpush1.bf16.msra.mxu1 %v1419_v28  ;;  %v1450_v49 = vld [vmem:[#allocation5 + $0x84] ss:$8 sps:$4 sm:$0xff]   ;;  %v1392_v50 = vld [vmem:[#allocation5 + $0x1e0] ss:$8 sps:$4 sm:$0xff]   ;;  %v1393_v51 = vld [vmem:[#allocation5 + $0x1f4] ss:$8 sps:$4 sm:$0xff]  }
  0x4a   :  { %701 = vmatprep.subr.bf16.mxu1 %v1420_v29  ;;  %v1455_v52 = vld [vmem:[#allocation5 + $0x80] ss:$8 sps:$4 sm:$0xff]   ;;  %v1456_v53 = vld [vmem:[#allocation5 + $0x94] ss:$8 sps:$4 sm:$0xff]   ;;  %v1395_v54 = vld [vmem:[#allocation5 + $0x1f0] ss:$8 sps:$4 sm:$0xff]  }
  0x4b   :  { %747 = vmatpush1.bf16.msra.mxu0 %v1362_v10  ;;  %v72_v55 = vld [vmem:[#allocation3 + $0x10] sm:$0xff]  ;;  %v79_v56 = vld [vmem:[#allocation3 + $0x48] sm:$0xff]  ;;  %v82_v63 = vld [vmem:[#allocation3 + $0x60] sm:$0xff] }
  0x4c   :  { %748 = vmatprep.subr.bf16.mxu0 %v1363_v11  ;;  %v1398_v57 = vld [vmem:[#allocation5 + $0x204] ss:$8 sps:$4 sm:$0xff]   ;;  %v1461_v58 = vld [vmem:[#allocation5 + $0x90] ss:$8 sps:$4 sm:$0xff]   ;;  %v1396_v59 = vld [vmem:[#allocation5 + $0x200] ss:$8 sps:$4 sm:$0xff]   ;;  %v86_v60 = vpack.c.bf16 %v79_v56, %v72_v55 }
  0x4d   :  { %702 = vmatpush1.bf16.msra.mxu1 %v1425_v32  ;;  %v1462_v61 = vld [vmem:[#allocation5 + $0xa4] ss:$8 sps:$4 sm:$0xff]   ;;  %v75_v62 = vld [vmem:[#allocation3 + $0x28] sm:$0xff]  ;;  %v1467_v2 = vld [vmem:[#allocation5 + $0xa0] ss:$8 sps:$4 sm:$0xff]  }
  0x4e   :  { %703 = vmatprep.subr.bf16.mxu1 %v1426_v33  ;;  %v1401_v0 = vld [vmem:[#allocation5 + $0x214] ss:$8 sps:$4 sm:$0xff]   ;;  %v89_v1 = vpack.c.bf16 %v82_v63, %v75_v62  ;;  %v1399_v4 = vld [vmem:[#allocation5 + $0x210] ss:$8 sps:$4 sm:$0xff]   ;;  %v1406_v5 = vld [vmem:[#allocation5 + $0x224] ss:$8 sps:$4 sm:$0xff]  }
  0x4f   :  { %749 = vmatpush1.bf16.msra.mxu0 %v1365_v12  ;;  %v1468_v3 = vld [vmem:[#allocation5 + $0xb4] ss:$8 sps:$4 sm:$0xff]   ;;  %v1473_v8 = vld [vmem:[#allocation5 + $0xb0] ss:$8 sps:$4 sm:$0xff]   ;;  %v1474_v10 = vld [vmem:[#allocation5 + $0xc4] ss:$8 sps:$4 sm:$0xff]  }
  0x50   :  { %750 = vmatprep.subr.bf16.mxu0 %v1366_v13  ;;  %v71_v6 = vld [vmem:[#allocation3 + $0x8] sm:$0xff]  ;;  %v78_v7 = vld [vmem:[#allocation3 + $0x40] sm:$0xff]  ;;  %v1404_v11 = vld [vmem:[#allocation5 + $0x220] ss:$8 sps:$4 sm:$0xff]  }
  0x51   :  { %704 = vmatpush1.bf16.msra.mxu1 %v1431_v36  ;;  %v85_v9 = vpack.c.bf16 %v78_v7, %v71_v6  ;;  %v1412_v12 = vld [vmem:[#allocation5 + $0x234] ss:$8 sps:$4 sm:$0xff]   ;;  %v1479_v13 = vld [vmem:[#allocation5 + $0xc0] ss:$8 sps:$4 sm:$0xff]   ;;  %v1410_v15 = vld [vmem:[#allocation5 + $0x230] ss:$8 sps:$4 sm:$0xff]  }
  0x52   :  { %705 = vmatprep.subr.bf16.mxu1 %v1432_v37  ;;  %v1480_v14 = vld [vmem:[#allocation5 + $0xd4] ss:$8 sps:$4 sm:$0xff]   ;;  %v1418_v16 = vld [vmem:[#allocation5 + $0x244] ss:$8 sps:$4 sm:$0xff]   ;;  %v1416_v19 = vld [vmem:[#allocation5 + $0x240] ss:$8 sps:$4 sm:$0xff]  }
  0x53   :  { %751 = vmatpush1.bf16.msra.mxu0 %v1368_v17  ;;  %727 = vmatprep.mubr.bf16.mxu1 %v85_v9  ;;  %v1485_v17 = vld [vmem:[#allocation5 + $0xd0] ss:$8 sps:$4 sm:$0xff]   ;;  %v1492_v22 = vld [vmem:[#allocation5 + $0xf4] ss:$8 sps:$4 sm:$0xff]   ;;  %v1428_v26 = vld [vmem:[#allocation5 + $0x260] ss:$8 sps:$4 sm:$0xff]  }
  0x54   :  { %752 = vmatprep.subr.bf16.mxu0 %v1369_v18  ;;  %v1486_v18 = vld [vmem:[#allocation5 + $0xe4] ss:$8 sps:$4 sm:$0xff]   ;;  %v1422_v23 = vld [vmem:[#allocation5 + $0x250] ss:$8 sps:$4 sm:$0xff]   ;;  %v1436_v29 = vld [vmem:[#allocation5 + $0x274] ss:$8 sps:$4 sm:$0xff]  }
  0x55   :  { %706 = vmatpush1.bf16.msra.mxu1 %v1437_v40  ;;  %v1494_v25 = vld [vmem:[#allocation5 + $0xf0] ss:$8 sps:$4 sm:$0xff]   ;;  %v77_v28 = vld [vmem:[#allocation3 + $0x38] sm:$0xff]  ;;  %v1503_v37 = vld [vmem:[#allocation7 + $0x24] ss:$8 sps:$4 sm:$0xff]  }
  0x56   :  { %707 = vmatprep.subr.bf16.mxu1 %v1438_v41  ;;  %v1495_v32 = vld [vmem:[#allocation7] ss:$8 sps:$4 sm:$0xff]   ;;  %v1500_v33 = vld [vmem:[#allocation7 + $0x14] ss:$8 sps:$4 sm:$0xff]   ;;  %v1498_v36 = vld [vmem:[#allocation7 + $0x10] ss:$8 sps:$4 sm:$0xff]  }
  0x57   :  { %753 = vmatpush1.bf16.msra.mxu0 %v1371_v20  ;;  %v1424_v20 = vld [vmem:[#allocation5 + $0x254] ss:$8 sps:$4 sm:$0xff]   ;;  %v1501_v40 = vld [vmem:[#allocation7 + $0x20] ss:$8 sps:$4 sm:$0xff]   ;;  %v1506_v41 = vld [vmem:[#allocation7 + $0x34] ss:$8 sps:$4 sm:$0xff]  }
  0x58   :  { %754 = vmatprep.subr.bf16.mxu0 %v1372_v21  ;;  %v1491_v21 = vld [vmem:[#allocation5 + $0xe0] ss:$8 sps:$4 sm:$0xff]   ;;  %v1472_v55 = vld [vmem:[#allocation5 + $0x2d4] ss:$8 sps:$4 sm:$0xff]   ;;  %v1513_v56 = vld [vmem:[#allocation7 + $0x60] ss:$8 sps:$4 sm:$0xff]  }
  0x59   :  { %708 = vmatpush1.bf16.msra.mxu1 %v1443_v44  ;;  %v1504_v44 = vld [vmem:[#allocation7 + $0x30] ss:$8 sps:$4 sm:$0xff]   ;;  %v1484_v63 = vld [vmem:[#allocation5 + $0x2f4] ss:$8 sps:$4 sm:$0xff]  }
  0x5a   :  { %709 = vmatprep.subr.bf16.mxu1 %v1444_v45  ;;  %v1509_v45 = vld [vmem:[#allocation7 + $0x44] ss:$8 sps:$4 sm:$0xff]   ;;  %v1476_v62 = vld [vmem:[#allocation5 + $0x2e0] ss:$8 sps:$4 sm:$0xff]  }
  0x5b   :  { %755 = vmatpush1.bf16.msra.mxu0 %v1374_v24  ;;  %v1430_v24 = vld [vmem:[#allocation5 + $0x264] ss:$8 sps:$4 sm:$0xff]   ;;  %v1522_v6 = vld [vmem:[#allocation7 + $0x90] ss:$8 sps:$4 sm:$0xff]  }
  0x5c   :  { %756 = vmatprep.subr.bf16.mxu0 %v1375_v27  ;;  %v70_v27 = vld [vmem:[#allocation3] sm:$0xff]  ;;  %v1488_v9 = vld [vmem:[#allocation5 + $0x300] ss:$8 sps:$4 sm:$0xff]  }
  0x5d   :  { %710 = vmatpush1.bf16.msra.mxu1 %v1449_v48  ;;  %v1507_v48 = vld [vmem:[#allocation7 + $0x40] ss:$8 sps:$4 sm:$0xff]  }
  0x5e   :  { %711 = vmatprep.subr.bf16.mxu1 %v1450_v49  ;;  %v1512_v49 = vld [vmem:[#allocation7 + $0x54] ss:$8 sps:$4 sm:$0xff]  }
  0x5f   :  { %757 = vmatpush1.bf16.msra.mxu0 %v1377_v30  ;;  %v1497_v30 = vld [vmem:[#allocation7 + $0x4] ss:$8 sps:$4 sm:$0xff]  }
  0x60   :  { %758 = vmatprep.subr.bf16.mxu0 %v1378_v31  ;;  %v84_v31 = vpack.c.bf16 %v77_v28, %v70_v27 }
  0x61   :  { %712 = vmatpush1.bf16.msra.mxu1 %v1455_v52  ;;  %v1510_v52 = vld [vmem:[#allocation7 + $0x50] ss:$8 sps:$4 sm:$0xff]  }
  0x62   :  { %713 = vmatprep.subr.bf16.mxu1 %v1456_v53  ;;  %v1515_v53 = vld [vmem:[#allocation7 + $0x64] ss:$8 sps:$4 sm:$0xff]  }
  0x63   :  { %759 = vmatpush1.bf16.msra.mxu0 %v1380_v34  ;;  %v1434_v34 = vld [vmem:[#allocation5 + $0x270] ss:$8 sps:$4 sm:$0xff]  }
  0x64   :  { %760 = vmatprep.subr.bf16.mxu0 %v1381_v35  ;;  %v1442_v35 = vld [vmem:[#allocation5 + $0x284] ss:$8 sps:$4 sm:$0xff]  }
  0x65   :  { %714 = vmatpush1.bf16.msra.mxu1 %v1461_v58  ;;  %v1470_v58 = vld [vmem:[#allocation5 + $0x2d0] ss:$8 sps:$4 sm:$0xff]  }
  0x66   :  { %715 = vmatprep.subr.bf16.mxu1 %v1462_v61  ;;  %v1521_v61 = vld [vmem:[#allocation7 + $0x84] ss:$8 sps:$4 sm:$0xff]  }
  0x67   :  { %761 = vmatpush1.bf16.msra.mxu0 %v1383_v38  ;;  %v1440_v38 = vld [vmem:[#allocation5 + $0x280] ss:$8 sps:$4 sm:$0xff]  }
  0x68   :  { %762 = vmatprep.subr.bf16.mxu0 %v1384_v39  ;;  %v1448_v39 = vld [vmem:[#allocation5 + $0x294] ss:$8 sps:$4 sm:$0xff]  }
  0x69   :  { %716 = vmatpush1.bf16.msra.mxu1 %v1467_v2  ;;  %v1482_v2 = vld [vmem:[#allocation5 + $0x2f0] ss:$8 sps:$4 sm:$0xff]  }
  0x6a   :  { %717 = vmatprep.subr.bf16.mxu1 %v1468_v3  ;;  %v74_v3 = vld [vmem:[#allocation3 + $0x20] sm:$0xff] }
  0x6b   :  { %763 = vmatpush1.bf16.msra.mxu0 %v1386_v42  ;;  %v1446_v42 = vld [vmem:[#allocation5 + $0x290] ss:$8 sps:$4 sm:$0xff]  }
  0x6c   :  { %764 = vmatprep.subr.bf16.mxu0 %v1387_v43  ;;  %v1454_v43 = vld [vmem:[#allocation5 + $0x2a4] ss:$8 sps:$4 sm:$0xff]  }
  0x6d   :  { %718 = vmatpush1.bf16.msra.mxu1 %v1473_v8  ;;  %v1527_v8 = vld [vmem:[#allocation7 + $0xa4] ss:$8 sps:$4 sm:$0xff]  }
  0x6e   :  { %719 = vmatprep.subr.bf16.mxu1 %v1474_v10  ;;  %v1525_v10 = vld [vmem:[#allocation7 + $0xa0] ss:$8 sps:$4 sm:$0xff]  }
  0x6f   :  { %765 = vmatpush1.bf16.msra.mxu0 %v1389_v46  ;;  %v1452_v46 = vld [vmem:[#allocation5 + $0x2a0] ss:$8 sps:$4 sm:$0xff]  }
  0x70   :  { %766 = vmatprep.subr.bf16.mxu0 %v1390_v47  ;;  %v1460_v47 = vld [vmem:[#allocation5 + $0x2b4] ss:$8 sps:$4 sm:$0xff]  }
  0x71   :  { %720 = vmatpush1.bf16.msra.mxu1 %v1479_v13  ;;  %v1528_v13 = vld [vmem:[#allocation7 + $0xb0] ss:$8 sps:$4 sm:$0xff]  }
  0x72   :  { %721 = vmatprep.subr.bf16.mxu1 %v1480_v14  ;;  %v76_v14 = vld [vmem:[#allocation3 + $0x30] sm:$0xff] }
  0x73   :  { %767 = vmatpush1.bf16.msra.mxu0 %v1392_v50  ;;  %v1458_v50 = vld [vmem:[#allocation5 + $0x2b0] ss:$8 sps:$4 sm:$0xff]  }
  0x74   :  { %768 = vmatprep.subr.bf16.mxu0 %v1393_v51  ;;  %v1466_v51 = vld [vmem:[#allocation5 + $0x2c4] ss:$8 sps:$4 sm:$0xff]  }
  0x75   :  { %722 = vmatpush1.bf16.msra.mxu1 %v1485_v17  ;;  %v1531_v17 = vld [vmem:[#allocation7 + $0xc0] ss:$8 sps:$4 sm:$0xff]  }
  0x76   :  { %723 = vmatprep.subr.bf16.mxu1 %v1486_v18  ;;  %v1533_v18 = vld [vmem:[#allocation7 + $0xc4] ss:$8 sps:$4 sm:$0xff]  }
  0x77   :  { %769 = vmatpush1.bf16.msra.mxu0 %v1395_v54  ;;  %v1464_v54 = vld [vmem:[#allocation5 + $0x2c0] ss:$8 sps:$4 sm:$0xff]  }
  0x78   :  { %781 = vmatprep.subr.bf16.mxu0 %v1398_v57  ;;  %v1518_v57 = vld [vmem:[#allocation7 + $0x74] ss:$8 sps:$4 sm:$0xff]  }
  0x79   :  { %724 = vmatpush1.bf16.msra.mxu1 %v1491_v21  ;;  %v1539_v21 = vld [vmem:[#allocation7 + $0xe4] ss:$8 sps:$4 sm:$0xff]  }
  0x7a   :  { %771 = vmatmul.mubr.bf16.vlgmr.msra.gmra.mrb[0].mxu0 %v86_v60  ;;  %725 = vmatprep.subr.bf16.mxu1 %v1492_v22  ;;  %v1516_v60 = vld [vmem:[#allocation7 + $0x70] ss:$8 sps:$4 sm:$0xff]   ;;  %v1537_v22 = vld [vmem:[#allocation7 + $0xe0] ss:$8 sps:$4 sm:$0xff]  }
  0x7b   :  { %782 = vmatpush1.bf16.msra.mxu0 %v1396_v59  ;;  %813 = vmatprep.mubr.bf16.mxu0 %v89_v1  ;;  %v1478_v59 = vld [vmem:[#allocation5 + $0x2e4] ss:$8 sps:$4 sm:$0xff]  }
  0x7c   :  { %783 = vmatprep.subr.bf16.mxu0 %v1401_v0  ;;  %v1519_v0 = vld [vmem:[#allocation7 + $0x80] ss:$8 sps:$4 sm:$0xff]   ;;  %v1524_v1 = vld [vmem:[#allocation7 + $0x94] ss:$8 sps:$4 sm:$0xff]  }
  0x7d   :  { %726 = vmatpush1.bf16.msra.mxu1 %v1494_v25 }
  0x7e   :  { %1085 = vmatprep.subr.bf16.mxu1 %v1497_v30 }
  0x7f   :  { %784 = vmatpush1.bf16.msra.mxu0 %v1399_v4  ;;  %v81_v4 = vld [vmem:[#allocation3 + $0x58] sm:$0xff] }
  0x80   :  { %785 = vmatprep.subr.bf16.mxu0 %v1406_v5  ;;  %728 = vmatmul.mubr.bf16.vlgmr.msra.gmra.mrb[0].mxu1 %v84_v31  ;;  %v1490_v5 = vld [vmem:[#allocation5 + $0x304] ss:$8 sps:$4 sm:$0xff]   ;;  %v88_v7 = vpack.c.bf16 %v81_v4, %v74_v3 }
  0x81   :  { %1086 = vmatpush1.bf16.msra.mxu1 %v1495_v32  ;;  %v189_v32 = vld [vmem:[%s1731_s2] sm:$0x3] }
  0x82   :  { %1087 = vmatprep.subr.bf16.mxu1 %v1500_v33 }
  0x83   :  { %786 = vmatpush1.bf16.msra.mxu0 %v1404_v11  ;;  %v1530_v11 = vld [vmem:[#allocation7 + $0xb4] ss:$8 sps:$4 sm:$0xff]  }
  0x84   :  { %787 = vmatprep.subr.bf16.mxu0 %v1412_v12  ;;  %v1628_v12 = vmov 0  }
  0x85   :  { %1088 = vmatpush1.bf16.msra.mxu1 %v1498_v36 }
  0x86   :  { %1089 = vmatprep.subr.bf16.mxu1 %v1503_v37 }
  0x87   :  { %788 = vmatpush1.bf16.msra.mxu0 %v1410_v15  ;;  %v83_v15 = vld [vmem:[#allocation3 + $0x68] sm:$0xff] }
  0x88   :  { %789 = vmatprep.subr.bf16.mxu0 %v1418_v16  ;;  %v90_v16 = vpack.c.bf16 %v83_v15, %v76_v14 }
  0x89   :  { %1090 = vmatpush1.bf16.msra.mxu1 %v1501_v40 }
  0x8a   :  { %1091 = vmatprep.subr.bf16.mxu1 %v1506_v41 }
  0x8b   :  { %790 = vmatpush1.bf16.msra.mxu0 %v1416_v19  ;;  %v1536_v19 = vld [vmem:[#allocation7 + $0xd4] ss:$8 sps:$4 sm:$0xff]  }
  0x8c   :  { %791 = vmatprep.subr.bf16.mxu0 %v1424_v20  ;;  %v1534_v20 = vld [vmem:[#allocation7 + $0xd0] ss:$8 sps:$4 sm:$0xff]  }
  0x8d   :  { %1092 = vmatpush1.bf16.msra.mxu1 %v1504_v44 }
  0x8e   :  { %1093 = vmatprep.subr.bf16.mxu1 %v1509_v45 }
  0x8f   :  { %792 = vmatpush1.bf16.msra.mxu0 %v1422_v23  ;;  %v1542_v23 = vld [vmem:[#allocation7 + $0xf4] ss:$8 sps:$4 sm:$0xff]  }
  0x90   :  { %793 = vmatprep.subr.bf16.mxu0 %v1430_v24  ;;  %v1540_v24 = vld [vmem:[#allocation7 + $0xf0] ss:$8 sps:$4 sm:$0xff]  }
  0x91   :  { %1094 = vmatpush1.bf16.msra.mxu1 %v1507_v48 }
  0x92   :  { %1095 = vmatprep.subr.bf16.mxu1 %v1512_v49 }
  0x93   :  { %794 = vmatpush1.bf16.msra.mxu0 %v1428_v26 }
  0x94   :  { %795 = vmatprep.subr.bf16.mxu0 %v1436_v29  ;;  %v191_v29 = vlaneseq }
  0x95   :  { %1096 = vmatpush1.bf16.msra.mxu1 %v1510_v52 }
  0x96   :  { %1097 = vmatprep.subr.bf16.mxu1 %v1515_v53  ;;  %v192_v30 = vshrl.u32 %v191_v29, 7 }
  0x97   :  { %796 = vmatpush1.bf16.msra.mxu0 %v1434_v34 }
  0x98   :  { %797 = vmatprep.subr.bf16.mxu0 %v1442_v35  ;;  %v193_v31 = vsub.s32 0, %v192_v30  ;;  %v197_v33 = vsub.s32 1, %v192_v30 }
  0x99   :  { %1098 = vmatpush1.bf16.msra.mxu1 %v1513_v56 }
  0x9a   :  { %1099 = vmatprep.subr.bf16.mxu1 %v1518_v57  ;;  %v194_v34 = vrot.slane %v189_v32, %v193_v31  ;;  %v198_v35 = vrot.slane %v189_v32, %v197_v33 }
  0x9b   :  { %798 = vmatpush1.bf16.msra.mxu0 %v1440_v38 }
  0x9c   :  { %799 = vmatprep.subr.bf16.mxu0 %v1448_v39 }
  0x9d   :  { %1100 = vmatpush1.bf16.msra.mxu1 %v1516_v60 }
  0x9e   :  { %1101 = vmatprep.subr.bf16.mxu1 %v1521_v61  ;;  %v1140_v61 = vld [vmem:[%s1734_s5] sm:$0x3] }
  0x9f   :  { %800 = vmatpush1.bf16.msra.mxu0 %v1446_v42  ;;  %v1145_v3 = vrot.slane %v1140_v61, %v193_v31 }
  0xa0   :  { %801 = vmatprep.subr.bf16.mxu0 %v1454_v43 }
  0xa1   :  { %1102 = vmatpush1.bf16.msra.mxu1 %v1519_v0 }
  0xa2   :  { %1103 = vmatprep.subr.bf16.mxu1 %v1524_v1 }
  0xa3   :  { %802 = vmatpush1.bf16.msra.mxu0 %v1452_v46 }
  0xa4   :  { %803 = vmatprep.subr.bf16.mxu0 %v1460_v47 }
  0xa5   :  { %1104 = vmatpush1.bf16.msra.mxu1 %v1522_v6 }
  0xa6   :  { %1105 = vmatprep.subr.bf16.mxu1 %v1527_v8 }
  0xa7   :  { %804 = vmatpush1.bf16.msra.mxu0 %v1458_v50 }
  0xa8   :  { %805 = vmatprep.subr.bf16.mxu0 %v1466_v51 }
  0xa9   :  { %1106 = vmatpush1.bf16.msra.mxu1 %v1525_v10 }
  0xaa   :  { %1107 = vmatprep.subr.bf16.mxu1 %v1530_v11 }
  0xab   :  { %806 = vmatpush1.bf16.msra.mxu0 %v1464_v54 }
  0xac   :  { %807 = vmatprep.subr.bf16.mxu0 %v1472_v55 }
  0xad   :  { %1108 = vmatpush1.bf16.msra.mxu1 %v1528_v13 }
  0xae   :  { %1109 = vmatprep.subr.bf16.mxu1 %v1533_v18 }
  0xaf   :  { %808 = vmatpush1.bf16.msra.mxu0 %v1470_v58  ;;  %v913_v58 = vld [vmem:[%s1733_s4] sm:$0x3] }
  0xb0   :  { %809 = vmatprep.subr.bf16.mxu0 %v1478_v59  ;;  %v918_v59 = vrot.slane %v913_v58, %v193_v31  ;;  %v922_v60 = vrot.slane %v913_v58, %v197_v33 }
  0xb1   :  { %1110 = vmatpush1.bf16.msra.mxu1 %v1531_v17 }
  0xb2   :  { %1111 = vmatprep.subr.bf16.mxu1 %v1536_v19 }
  0xb3   :  { %810 = vmatpush1.bf16.msra.mxu0 %v1476_v62 }
  0xb4   :  { %811 = vmatprep.subr.bf16.mxu0 %v1484_v63 }
  0xb5   :  { %1112 = vmatpush1.bf16.msra.mxu1 %v1534_v20 }
  0xb6   :  { %1113 = vmatprep.subr.bf16.mxu1 %v1539_v21 }
  0xb7   :  { %812 = vmatpush1.bf16.msra.mxu0 %v1482_v2 }
  0xb8   :  { %824 = vmatprep.subr.bf16.mxu0 %v1490_v5 }
  0xb9   :  { %1114 = vmatpush1.bf16.msra.mxu1 %v1537_v22  ;;  %v1323_v22 = vld [vmem:[#allocation2] ss:$0 sm:$0xff] }
  0xba   :  { %814 = vmatmul.mubr.bf16.vlgmr.msra.gmra.mrb[0].mxu0 %v88_v7  ;;  %1115 = vmatprep.subr.bf16.mxu1 %v1542_v23  ;;  %v1149_v7 = vrot.slane %v1140_v61, %v197_v33 }
  0xbb   :  { %825 = vmatpush1.bf16.msra.mxu0 %v1488_v9  ;;  %856 = vmatprep.mubr.bf16.mxu0 %v1628_v12 }
  0xbd   :  { %1116 = vmatpush1.bf16.msra.mxu1 %v1540_v24 }
  0xc6   :  { %1290 = vmatmul.mubr.msk.bf16.vlgmr.msra.gmra.mrb[0].mxu0 %vm691_vm0, %v90_v16 }
 0x153   :  { %v729_v25 = vpop.f32.mrb[0].mxu1 }
 0x154   :  { %v731_v26 = vpop.f32.mrb[1].mxu1  ;;  %v730_v36 = vadd.f32 %v729_v25, %v194_v34 }
 0x155   :  { %v733_v27 = vpop.f32.mrb[2].mxu1  ;;  %v732_v37 = vadd.f32 %v731_v26, %v198_v35 }
 0x156   :  { %v735_v28 = vpop.f32.mrb[3].mxu1  ;;  %v734_v39 = vadd.f32 %v733_v27, %v194_v34 }
 0x157   :  { %v736_v42 = vadd.f32 %v735_v28, %v198_v35 }
 0x199   :  { %v858_v38 = vpop.f32.mrb[0].mxu0 }
 0x19a   :  { %v1325_v40 = vadd.f32 %v858_v38, %v730_v36  ;;  %v860_v41 = vpop.f32.mrb[1].mxu0 }
 0x19b   :  { %v1327_v43 = vadd.f32 %v860_v41, %v732_v37  ;;  %v862_v44 = vpop.f32.mrb[2].mxu0 }
 0x19c   :  { %v871_v45 = vmul.f32 0.2, %v1325_v40  ;;  %v1329_v46 = vadd.f32 %v862_v44, %v734_v39  ;;  %v864_v47 = vpop.f32.mrb[3].mxu0  ;;  %vm867_vm1 = vcmp.gt.f32.partialorder %v1325_v40, 0.0 }
 0x19d   :  { %v872_v48 = vmul.f32 0.2, %v1327_v43  ;;  %v1331_v49 = vadd.f32 %v864_v47, %v736_v42  ;;  %vm868_vm2 = vcmp.gt.f32.partialorder %v1327_v43, 0.0 }
 0x19e   :  { %vm869_vm3 = vcmp.gt.f32.partialorder %v1329_v46, 0.0  ;;  %v873_v50 = vmul.f32 0.2, %v1329_v46  ;;  %v875_v52 = vsel %vm867_vm1, %v1325_v40, %v871_v45 }
 0x19f   :  { %vm870_vm4 = vcmp.gt.f32.partialorder %v1331_v49, 0.0  ;;  %v874_v51 = vmul.f32 0.2, %v1331_v49  ;;  %v876_v55 = vsel %vm868_vm2, %v1327_v43, %v872_v48 }
 0x1a0   :  { %v877_v53 = vsel %vm869_vm3, %v1329_v46, %v873_v50 }
 0x1a1   :  { %v879_v54 = vpack.c.bf16 %v877_v53, %v875_v52  ;;  %v878_v56 = vsel %vm870_vm4, %v1331_v49, %v874_v51 }
 0x1a2   :  { %v880_v57 = vpack.c.bf16 %v878_v56, %v876_v55 }
 0x1a4   :  { %1117 = vmatprep.mubr.bf16.mxu1 %v880_v57 }
 0x1a5   :  { %1118 = vmatmul.mubr.bf16.vlgmr.msra.gmra.mrb[4].mxu1 %v879_v54 }
 0x278   :  { %v1119_v62 = vpop.f32.mrb[4].mxu1 }
 0x279   :  { %v1120_v63 = vadd.f32 %v1119_v62, %v918_v59  ;;  %v1121_v0 = vpop.f32.mrb[5].mxu1 }
 0x27a   :  { %v1122_v1 = vadd.f32 %v1121_v0, %v922_v60  ;;  %v1123_v2 = vpop.f32.mrb[6].mxu1 }
 0x27b   :  { %vm1128_vm5 = vcmp.gt.f32.partialorder %v1120_v63, 0.0  ;;  %v1132_v4 = vmul.f32 0.2, %v1120_v63  ;;  %v1124_v5 = vadd.f32 %v1123_v2, %v918_v59  ;;  %v1125_v6 = vpop.f32.mrb[7].mxu1 }
 0x27c   :  { %vm1129_vm6 = vcmp.gt.f32.partialorder %v1122_v1, 0.0  ;;  %v1133_v8 = vmul.f32 0.2, %v1122_v1  ;;  %v1126_v9 = vadd.f32 %v1125_v6, %v922_v60 }
 0x27d   :  { %vm1130_vm7 = vcmp.gt.f32.partialorder %v1124_v5, 0.0  ;;  %v1134_v10 = vmul.f32 0.2, %v1124_v5  ;;  %v1136_v11 = vsel %vm1128_vm5, %v1120_v63, %v1132_v4 }
 0x27e   :  { %vm1131_vm8 = vcmp.gt.f32.partialorder %v1126_v9, 0.0  ;;  %v1135_v12 = vmul.f32 0.2, %v1126_v9  ;;  %v1137_v13 = vsel %vm1129_vm6, %v1122_v1, %v1133_v8  ;;  %v1152_v14 = vmul.f32 %v1145_v3, %v1136_v11 }
 0x27f   :  { %v1153_v15 = vmul.f32 %v1149_v7, %v1137_v13  ;;  %v1138_v16 = vsel %vm1130_vm7, %v1124_v5, %v1134_v10 }
 0x280   :  { %v1139_v17 = vsel %vm1131_vm8, %v1126_v9, %v1135_v12  ;;  %v1154_v18 = vmul.f32 %v1145_v3, %v1138_v16 }
 0x281   :  { %v1156_v19 = vadd.f32 %v1153_v15, %v1152_v14  ;;  %v1155_v20 = vmul.f32 %v1149_v7, %v1139_v17 }
 0x283   :  { %1157 = vadd.xlane.f32.xlu0 %v1156_v19  ;;  %v1159_v21 = vadd.f32 %v1155_v20, %v1154_v18 }
 0x287   :  { %1160 = vadd.xlane.f32.xlu0 %v1159_v21 }
 0x310   :  { %v1158_v23 = vpop.xlane.xlu0 %1157 }
 0x311   :  { %v1169_v24 = vadd.f32 %v1323_v22, %v1158_v23 }
 0x313   :  { %v1171_v25 = vsub.f32 0.0, %v1169_v24 }
 0x314   :  { %v1161_v26 = vpop.xlane.xlu0 %1160 }
 0x315   :  { %v1173_v27 = vmul.f32 1.442695, %v1171_v25  ;;  %v1170_v28 = vadd.f32 %v1323_v22, %v1161_v26 }
 0x317   :  { %1543 = vpow2.f32 %v1173_v27  ;;  %v1172_v29 = vsub.f32 0.0, %v1170_v28 }
 0x319   :  { %v1175_v30 = vmul.f32 1.442695, %v1172_v29 }
 0x31b   :  { %1545 = vpow2.f32 %v1175_v30 }
 0x321   :  { %v1544_v31 = vpop.eup %1543 }
 0x322   :  { %v1177_v32 = vadd.f32 1.0, %v1544_v31 }
 0x324   :  { %1547 = vrcp.f32 %v1177_v32 }
 0x325   :  { %v1546_v33 = vpop.eup %1545 }
 0x326   :  { %v1178_v34 = vadd.f32 1.0, %v1546_v33 }
 0x328   :  { %1549 = vrcp.f32 %v1178_v34 }
 0x32e   :  { %v1548_v35 = vpop.eup %1547 }
 0x32f   :  { %1184 = vst.msk [vmem:[%s1736_s7] sm:$0xff] %vm1183_vm9, %v1548_v35 }
 0x332   :  { %v1550_v36 = vpop.eup %1549 }
 0x333   :  { %1185 = vst.msk [vmem:[%s1736_s7 + $0x8] sm:$0xff] %vm1183_vm9, %v1550_v36 }
 0x334   :  { %1190 = vsyncpa [#allocation4], 1 }
 0x335   :  { %1191 = vsyncpa [#allocation6], 1 }

</bundles_post_ra>
